<compile_context>
chip_gen: v7x
topology: tpu7x:2x2x1
jax: 0.10.0
libtpu: 0.0.40
codegen_flags: <defaults>
</compile_context>

<pallas_src>
import functools

import jax
import jax.numpy as jnp
from jax import lax
from jax.experimental import pallas as pl
from jax.experimental.pallas import tpu as pltpu

LANE = 128


def _conv_relu_kernel(p_ref, w_ref, b_ref, o_ref):
    """One (row-tile, cout-tile) block of the fused im2col-matmul + bias + ReLU.

    p_ref: (TM, Kp)  bf16 im2col patches for this row tile (K zero-padded)
    w_ref: (Kp, TN)  bf16 weights for this Cout tile (zero-padded)
    b_ref: (1, TN)   f32 bias (zero-padded)
    o_ref: (TM, TN)  lane-dense output tile
    """
    acc = jnp.dot(p_ref[...], w_ref[...], preferred_element_type=jnp.float32)
    acc = acc + b_ref[...]          # bias, f32 on VPU
    # scaler is nn.Identity -> no-op; ReLU epilogue in f32.
    o_ref[...] = jnp.maximum(acc, 0.0).astype(o_ref.dtype)


def _round_up(x, m):
    return ((x + m - 1) // m) * m


def conv_relu(x_nchw, weight_oihw, bias, *, stride=1, padding=0, dilation=1,
              groups=1, tile_rows=512, mxu_dtype=jnp.bfloat16, out_dtype=None):
    """ConvReLU forward. Input/output are NCHW like PyTorch."""
    if groups != 1:
        raise NotImplementedError("grouped conv not implemented in-kernel")
    N, Cin, H, W = x_nchw.shape
    Cout, Cin_w, KH, KW = weight_oihw.shape
    assert Cin_w == Cin
    if out_dtype is None:
        out_dtype = x_nchw.dtype
    if bias is None:
        bias = jnp.zeros((Cout,), jnp.float32)

    # ---- Wrapper-side layout glue (fused into the same jit) -----------------
    # Cast to the MXU dtype BEFORE im2col so the KH*KW-duplicated patch matrix
    # only ever exists in HBM at bf16 width.
    x = jnp.transpose(x_nchw, (0, 2, 3, 1)).astype(mxu_dtype)   # NHWC, bf16
    x = jnp.pad(x, ((0, 0), (padding, padding), (padding, padding), (0, 0)))
    Hp, Wp = H + 2 * padding, W + 2 * padding
    OH = (Hp - dilation * (KH - 1) - 1) // stride + 1
    OW = (Wp - dilation * (KW - 1) - 1) // stride + 1

    # im2col: concatenate the KH*KW shifted/strided views along the channel
    # (contraction) axis -> (N*OH*OW, KH*KW*Cin).
    taps = []
    for kh in range(KH):
        for kw in range(KW):
            h0, w0 = kh * dilation, kw * dilation
            taps.append(lax.slice(
                x, (0, h0, w0, 0),
                (N, h0 + (OH - 1) * stride + 1,
                 w0 + (OW - 1) * stride + 1, Cin),
                (1, stride, stride, 1)))                        # (N,OH,OW,Cin)
    K = KH * KW * Cin
    patches = jnp.concatenate(taps, axis=-1).reshape(N * OH * OW, K)

    # Weights -> (K, Cout), matching the (kh, kw, cin) contraction order.
    w2d = jnp.transpose(weight_oihw, (2, 3, 1, 0)).reshape(K, Cout)
    w2d = w2d.astype(mxu_dtype)

    # Pad K to a 128 multiple (lane axis of patches / sublane axis of bf16
    # weights) and Cout to a 128-lane multiple -> unmasked, aligned accesses.
    Kp = _round_up(K, LANE)
    Cp = _round_up(Cout, LANE)
    w2d = jnp.pad(w2d, ((0, Kp - K), (0, Cp - Cout)))
    b2d = jnp.pad(bias.reshape(1, Cout).astype(jnp.float32),
                  ((0, 0), (0, Cp - Cout)))

    # Row tiling: big tiles amortize per-grid-step overhead, but keep >= 4
    # grid steps so the pipeline and v7x's two TensorCores stay busy.
    R = N * OH * OW
    TM = int(tile_rows)
    while TM > 128 and _round_up(R, TM) // TM < 4:
        TM //= 2
    TM = min(TM, _round_up(R, 8))
    TM = _round_up(TM, 8)
    Rp = _round_up(R, TM)
    patches = jnp.pad(patches, ((0, Rp - R), (0, Kp - K)))

    # Cout tiling: feed the 256-wide MXU (v6e/v7x) a full output tile when the
    # padded Cout allows, and bound the resident weight block for large layers.
    TN = 256 if Cp % 256 == 0 else LANE

    grid = (Rp // TM, Cp // TN)

    cost = pl.CostEstimate(
        flops=2 * Rp * Kp * Cp,
        transcendentals=0,
        bytes_accessed=(patches.size * patches.dtype.itemsize
                        + w2d.size * w2d.dtype.itemsize
                        + b2d.size * b2d.dtype.itemsize
                        + Rp * Cp * jnp.dtype(out_dtype).itemsize))

    # NOTE: the weight/bias index_maps are constant along the row axis, so
    # Pallas only DMAs them once; for very large layers single-buffering them
    # (pipeline_mode) would free additional VMEM for a bigger TM/TN.
    out2d = pl.pallas_call(
        _conv_relu_kernel,
        out_shape=jax.ShapeDtypeStruct((Rp, Cp), out_dtype),
        grid=grid,
        in_specs=[
            pl.BlockSpec((TM, Kp), lambda i, j: (i, 0)),    # per-tile patches
            pl.BlockSpec((Kp, TN), lambda i, j: (0, j)),    # weights (resident)
            pl.BlockSpec((1, TN), lambda i, j: (0, j)),     # bias (resident)
        ],
        out_specs=pl.BlockSpec((TM, TN), lambda i, j: (i, j)),
        compiler_params=pltpu.CompilerParams(
            dimension_semantics=("parallel", "parallel"),   # megacore-friendly
            vmem_limit_bytes=32 * 1024 * 1024),             # fits v7x 64MiB/TC
        cost_estimate=cost,
    )(patches, w2d, b2d)

    # Tail layout glue stays inside the same jit so XLA fuses it.
    out = out2d[:R, :Cout].reshape(N, OH, OW, Cout)
    return jnp.transpose(out, (0, 3, 1, 2))                     # back to NCHW


def _reference_conv_relu(x_nchw, weight_oihw, bias, *, stride, padding,
                         dilation, operand_dtype=jnp.float32):
    out = lax.conv_general_dilated(
        x_nchw.astype(operand_dtype), weight_oihw.astype(operand_dtype),
        window_strides=(stride, stride),
        padding=((padding, padding), (padding, padding)),
        rhs_dilation=(dilation, dilation),
        dimension_numbers=("NCHW", "OIHW", "NCHW"),
        preferred_element_type=jnp.float32)
    out = out + bias.reshape(1, -1, 1, 1)
    return jnp.maximum(out, 0.0)


if __name__ == "__main__":
    # Module config: ConvReLU(in_channels=4, out_channels=8, kernel_size=3,
    #                         stride=1, padding=1, bias=True)
    in_channels, out_channels, kernel_size = 4, 8, 3
    stride, padding, dilation = 1, 1, 1

    key = jax.random.PRNGKey(0)
    kx, kw, kb = jax.random.split(key, 3)

    x = jax.random.normal(kx, (2, in_channels, 16, 16), dtype=jnp.float32)
    fan_in = in_channels * kernel_size * kernel_size
    w_scale = 1.0 / jnp.sqrt(fan_in)
    weight = w_scale * jax.random.normal(
        kw, (out_channels, in_channels, kernel_size, kernel_size),
        dtype=jnp.float32)
    bias = w_scale * jax.random.normal(kb, (out_channels,), dtype=jnp.float32)

    # jit the whole wrapper: im2col, pallas_call and the tail reshape/transpose
    # compile as one program (no extra full-tensor pass at the tail).
    fwd = jax.jit(functools.partial(conv_relu, stride=stride, padding=padding,
                                    dilation=dilation))
    out = jax.block_until_ready(fwd(x, weight, bias))

    # Reference with the same bf16 operand / f32 accumulation numerics.
    ref_bf16 = _reference_conv_relu(x, weight, bias, stride=stride,
                                    padding=padding, dilation=dilation,
                                    operand_dtype=jnp.bfloat16)
    # Loose sanity check against the pure-f32 (PyTorch-semantics) reference.
    ref_f32 = _reference_conv_relu(x, weight, bias, stride=stride,
                                   padding=padding, dilation=dilation,
                                   operand_dtype=jnp.float32)

    assert out.shape == ref_f32.shape == (2, out_channels, 16, 16)
    assert jnp.allclose(out, ref_bf16, atol=2e-3, rtol=2e-3)
    assert jnp.allclose(out, ref_f32, atol=5e-2, rtol=5e-2)

    print("KERNEL_OK")
</pallas_src>

<mosaic_0001>
module attributes {stable_mosaic.version = 11 : i64} {
  func.func @_conv_relu_kernel(%arg0: i32, %arg1: i32, %arg2: memref<128x128xbf16, #tpu.memory_space<vmem>>, %arg3: memref<128x128xbf16, #tpu.memory_space<vmem>>, %arg4: memref<1x128xf32, #tpu.memory_space<vmem>>, %arg5: memref<128x128xf32, #tpu.memory_space<vmem>>) attributes {dimension_semantics = [#tpu.dimension_semantics<parallel>, #tpu.dimension_semantics<parallel>], iteration_bounds = array<i64: 4, 1>, scalar_prefetch = 0 : i64, scratch_operands = 0 : i64, tpu.core_type = #tpu.core_type<tc>, window_params = [{transform_indices = @transform_0, window_bounds = array<i64: 128, 128>}, {transform_indices = @transform_1, window_bounds = array<i64: 128, 128>}, {transform_indices = @transform_2, window_bounds = array<i64: 1, 128>}, {transform_indices = @transform_3, window_bounds = array<i64: 128, 128>}]} {
    %c0 = arith.constant 0 : index
    %c0_0 = arith.constant 0 : index
    %0 = vector.load %arg2[%c0, %c0_0] : memref<128x128xbf16, #tpu.memory_space<vmem>>, vector<128x128xbf16>
    %c0_1 = arith.constant 0 : index
    %c0_2 = arith.constant 0 : index
    %1 = vector.load %arg3[%c0_1, %c0_2] : memref<128x128xbf16, #tpu.memory_space<vmem>>, vector<128x128xbf16>
    %cst = arith.constant dense<0.000000e+00> : vector<128x128xf32>
    %2 = tpu.matmul %0, %1, %cst {dimension_numbers = #tpu.dot_dimension_numbers<[1], [0], [0], [1], [0, 0, 1, 1], [], []>} : vector<128x128xbf16>, vector<128x128xbf16>, vector<128x128xf32> -> vector<128x128xf32>
    %c0_3 = arith.constant 0 : index
    %c0_4 = arith.constant 0 : index
    %3 = vector.load %arg4[%c0_3, %c0_4] : memref<1x128xf32, #tpu.memory_space<vmem>>, vector<1x128xf32>
    %4 = vector.broadcast %3 : vector<1x128xf32> to vector<128x128xf32>
    %5 = arith.addf %2, %4 : vector<128x128xf32>
    %cst_5 = arith.constant 0.000000e+00 : f32
    %6 = vector.broadcast %cst_5 : f32 to vector<128x128xf32>
    %7 = arith.maximumf %5, %6 : vector<128x128xf32>
    %c0_6 = arith.constant 0 : index
    %c0_7 = arith.constant 0 : index
    %8 = vector.load %arg5[%c0_6, %c0_7] : memref<128x128xf32, #tpu.memory_space<vmem>>, vector<128x128xf32>
    tpu.vector_store %arg5[%c0_6, %c0_7], %7 {strides = array<i32>} : memref<128x128xf32, #tpu.memory_space<vmem>>, vector<128x128xf32>,
    return
  }
  func.func @transform_0(%arg0: i32, %arg1: i32) -> (i32, i32) {
    %c0_i32 = arith.constant 0 : i32
    %c0_i32_0 = arith.constant 0 : i32
    return %arg0, %c0_i32 : i32, i32
  }
  func.func @transform_1(%arg0: i32, %arg1: i32) -> (i32, i32) {
    %c0_i32 = arith.constant 0 : i32
    %c0_i32_0 = arith.constant 0 : i32
    return %c0_i32, %arg1 : i32, i32
  }
  func.func @transform_2(%arg0: i32, %arg1: i32) -> (i32, i32) {
    %c0_i32 = arith.constant 0 : i32
    %c0_i32_0 = arith.constant 0 : i32
    return %c0_i32, %arg1 : i32, i32
  }
  func.func @transform_3(%arg0: i32, %arg1: i32) -> (i32, i32) {
    %c0_i32 = arith.constant 0 : i32
    return %arg0, %arg1 : i32, i32
  }
}

</mosaic_0001>

<bundles_post_ra>
// kernel: conv_relu.1
= control target key start
LH: loop header
LB: loop body
LE: loop exit
PB: predicated region body
PF: predicated region fallthrough
CT: control target
= control target key end

     0   :  { %s770_s12 = smov 0   ;;  %s772_s13 = smov 0   ;;  %s862_s0 = inlined_call_operand.vmem [shape: bf16[512,128], index: 0, kind: input, shape index: {}]   ;;  %s863_s1 = inlined_call_operand.vmem [shape: bf16[128,128], index: 1, kind: input, shape index: {}]   ;;  %s864_s2 = inlined_call_operand.vmem [shape: f32[1,128], index: 2, kind: input, shape index: {}]   ;;  %s865_s3 = inlined_call_operand.vmem [shape: f32[512,128], index: 3, kind: output, shape index: {}]  }
   0x1   :  { %s774_s14 = smov 0  }
   0x2 LB: > { %s25_s15 = sadd.s32 1, %s744_s13  ;;  %p598_p0 = scmp.ge.s32.totalorder %s748_s14, 1  ;;  %s748_s14 = sphi %s774_s14, %s13_s14   ;;  %s744_s13 = sphi %s772_s13, %s867_s13   ;;  %s740_s12 = sphi %s770_s12, %s866_s12  }
   0x3   : > { %p27_p1 = scmp.ge.s32.totalorder %s25_s15, 4  ;;  %p169_p2 = scmp.lt.s32.totalorder %s748_s14, 5 }
   0x5   : > { %s869_s15 = smov (%p27_p1, %s25_s15), 0  ;;  %p170_p3 = pnand %p598_p0, %p169_p2 }
   0x6   : > { %v710_v0 = vld [vmem:[%s863_s1] sm:$0xff] (!%p170_p3)   ;;  %s599_s18 = sshll.u32 (!%p170_p3), %s740_s12, 4  ;;  %v711_v1 = vld [vmem:[%s863_s1 + $0x8] sm:$0xff] (!%p170_p3)   ;;  %v712_v2 = vld [vmem:[%s863_s1 + $0x10] sm:$0xff] (!%p170_p3)  }
   0x7   : > { %173 = sbr.rel (%p170_p3) target bundleno = 267 (0x10b), region = 32  ;;  %p204_p4 = scmp.lt.s32.totalorder (!%p170_p3), %s599_s18, 63  ;;  %638 = vmatprep.subr.bf16.mxu0 (!%p170_p3), %v710_v0  ;;  %670 = vmatprep.subr.bf16.mxu1 (!%p170_p3), %v710_v0  ;;  %v713_v3 = vld [vmem:[%s863_s1 + $0x18] sm:$0xff] (!%p170_p3)   ;;  %v714_v6 = vld [vmem:[%s863_s1 + $0x20] sm:$0xff] (!%p170_p3)   ;;  %v715_v7 = vld [vmem:[%s863_s1 + $0x28] sm:$0xff] (!%p170_p3)  }
   0x8   : > { %639 = vmatpush3.bf16.msra.mxu0 (!%p170_p3), %v710_v0  ;;  %678 = vmatpush3.bf16.msra.mxu1 (!%p170_p3), %v710_v0  ;;  %v716_v8 = vld [vmem:[%s863_s1 + $0x30] sm:$0xff] (!%p170_p3)   ;;  %v717_v9 = vld [vmem:[%s863_s1 + $0x38] sm:$0xff] (!%p170_p3)   ;;  %v603_v16 = vld [vmem:[%s864_s2] ss:$0 sm:$0xff] (!%p170_p3) }
   0x9   : > { %640 = vmatprep.subr.bf16.mxu0 (!%p170_p3), %v711_v1  ;;  %671 = vmatprep.subr.bf16.mxu1 (!%p170_p3), %v711_v1 }
   0xc   : > { %641 = vmatpush3.bf16.msra.mxu0 (!%p170_p3), %v711_v1  ;;  %679 = vmatpush3.bf16.msra.mxu1 (!%p170_p3), %v711_v1 }
   0xd   : > { %642 = vmatprep.subr.bf16.mxu0 (!%p170_p3), %v712_v2  ;;  %672 = vmatprep.subr.bf16.mxu1 (!%p170_p3), %v712_v2 }
   0xe   : > { %s871_s18 = smov (!%p204_p4, %s599_s18), 63 }
   0xf   : > { %s600_s23 = sshll.u32 %s871_s18, 2  ;;  %s602_s12 = sshll.u32 %s871_s18, 3 }
  0x10   : > { %s803_s26 = scalar_lea.vmem %s862_s0, %s600_s23  ;;  %643 = vmatpush3.bf16.msra.mxu0 %v712_v2  ;;  %680 = vmatpush3.bf16.msra.mxu1 %v712_v2  ;;  %s835_s19 = scalar_lea.vmem %s865_s3, %s602_s12 }
  0x11   : > { %v718_v4 = vld [vmem:[%s803_s26] sm:$0xff]   ;;  %644 = vmatprep.subr.bf16.mxu0 %v713_v3  ;;  %673 = vmatprep.subr.bf16.mxu1 %v713_v3  ;;  %v720_v10 = vld [vmem:[%s803_s26 + $0x8] sm:$0xff]   ;;  %v722_v12 = vld [vmem:[%s803_s26 + $0x10] sm:$0xff]  }
  0x12   : > { %v719_v5 = vld [vmem:[%s803_s26 + $0x20] sm:$0xff]   ;;  %654 = vmatprep.mubr.bf16.mxu0 %v718_v4  ;;  %v721_v11 = vld [vmem:[%s803_s26 + $0x28] sm:$0xff]   ;;  %v723_v13 = vld [vmem:[%s803_s26 + $0x30] sm:$0xff]  }
  0x13   : > { %662 = vmatprep.mubr.bf16.mxu1 %v719_v5  ;;  %v724_v14 = vld [vmem:[%s803_s26 + $0x18] sm:$0xff]  }
  0x14   : > { %645 = vmatpush3.bf16.msra.mxu0 %v713_v3  ;;  %681 = vmatpush3.bf16.msra.mxu1 %v713_v3  ;;  %v725_v15 = vld [vmem:[%s803_s26 + $0x38] sm:$0xff]  }
  0x15   : > { %646 = vmatprep.subr.bf16.mxu0 %v714_v6  ;;  %674 = vmatprep.subr.bf16.mxu1 %v714_v6 }
  0x18   : > { %647 = vmatpush3.bf16.msra.mxu0 %v714_v6  ;;  %682 = vmatpush3.bf16.msra.mxu1 %v714_v6 }
  0x19   : > { %648 = vmatprep.subr.bf16.mxu0 %v715_v7  ;;  %675 = vmatprep.subr.bf16.mxu1 %v715_v7 }
  0x1c   : > { %649 = vmatpush3.bf16.msra.mxu0 %v715_v7  ;;  %683 = vmatpush3.bf16.msra.mxu1 %v715_v7 }
  0x1d   : > { %650 = vmatprep.subr.bf16.mxu0 %v716_v8  ;;  %676 = vmatprep.subr.bf16.mxu1 %v716_v8 }
  0x20   : > { %651 = vmatpush3.bf16.msra.mxu0 %v716_v8  ;;  %684 = vmatpush3.bf16.msra.mxu1 %v716_v8 }
  0x21   : > { %652 = vmatprep.subr.bf16.mxu0 %v717_v9  ;;  %677 = vmatprep.subr.bf16.mxu1 %v717_v9 }
  0x24   : > { %653 = vmatpush3.bf16.msra.mxu0 %v717_v9  ;;  %685 = vmatpush3.bf16.msra.mxu1 %v717_v9 }
  0x27   : > { %655 = vmatmul.mubr.bf16.vlgmr.msra.gmra.mrb[0].mxu0 %v720_v10  ;;  %663 = vmatmul.mubr.bf16.vlgmr.msra.gmra.mrb[0].mxu1 %v721_v11 }
  0x28   : > { %658 = vmatprep.mubr.bf16.mxu0 %v722_v12  ;;  %666 = vmatprep.mubr.bf16.mxu1 %v723_v13 }
  0x2f   : > { %659 = vmatmul.mubr.bf16.gmra.mrb[4].mxu0 %v724_v14  ;;  %667 = vmatmul.mubr.bf16.gmra.mrb[4].mxu1 %v725_v15 }
  0xfa   : > { %v656_v17 = vpop.f32.mrb[0].mxu0  ;;  %v664_v18 = vpop.f32.mrb[0].mxu1 }
  0xfb   : > { %v404_v19 = vadd.f32 %v656_v17, %v603_v16  ;;  %v436_v20 = vadd.f32 %v664_v18, %v603_v16  ;;  %v395_v21 = vpop.f32.mrb[1].mxu0  ;;  %v427_v22 = vpop.f32.mrb[1].mxu1 }
  0xfc   : > { %v396_v23 = vadd.f32 %v603_v16, %v395_v21  ;;  %v428_v24 = vadd.f32 %v603_v16, %v427_v22  ;;  %v657_v25 = vpop.f32.mrb[2].mxu0  ;;  %v665_v26 = vpop.f32.mrb[2].mxu1 }
  0xfd   : > { %v460_v27 = vmax.f32 %v404_v19, 0.0  ;;  %v468_v28 = vmax.f32 %v436_v20, 0.0  ;;  %v407_v29 = vadd.f32 %v657_v25, %v603_v16  ;;  %v439_v30 = vadd.f32 %v665_v26, %v603_v16  ;;  %v398_v31 = vpop.f32.mrb[3].mxu0  ;;  %v430_v32 = vpop.f32.mrb[3].mxu1 }
  0xfe   : > { %v458_v33 = vmax.f32 %v396_v23, 0.0  ;;  %v466_v34 = vmax.f32 %v428_v24, 0.0  ;;  %v399_v35 = vadd.f32 %v603_v16, %v398_v31  ;;  %v431_v36 = vadd.f32 %v603_v16, %v430_v32 }
  0xff   : > { %476 = vst [vmem:[%s835_s19 + $0x10] sm:$0xff] %v460_v27  ;;  %484 = vst [vmem:[%s835_s19 + $0x50] sm:$0xff] %v468_v28  ;;  %v461_v37 = vmax.f32 %v407_v29, 0.0  ;;  %v469_v38 = vmax.f32 %v439_v30, 0.0 }
 0x100   : > { %474 = vst [vmem:[%s835_s19] sm:$0xff] %v458_v33  ;;  %482 = vst [vmem:[%s835_s19 + $0x40] sm:$0xff] %v466_v34  ;;  %v459_v39 = vmax.f32 %v399_v35, 0.0  ;;  %v467_v40 = vmax.f32 %v431_v36, 0.0 }
 0x101   : > { %477 = vst [vmem:[%s835_s19 + $0x18] sm:$0xff] %v461_v37  ;;  %485 = vst [vmem:[%s835_s19 + $0x58] sm:$0xff] %v469_v38 }
 0x102   : > { %475 = vst [vmem:[%s835_s19 + $0x8] sm:$0xff] %v459_v39  ;;  %483 = vst [vmem:[%s835_s19 + $0x48] sm:$0xff] %v467_v40  ;;  %v660_v41 = vpop.f32.mrb[4].mxu0  ;;  %v668_v42 = vpop.f32.mrb[4].mxu1 }
 0x103   : > { %v420_v43 = vadd.f32 %v660_v41, %v603_v16  ;;  %v452_v44 = vadd.f32 %v668_v42, %v603_v16  ;;  %v411_v45 = vpop.f32.mrb[5].mxu0  ;;  %v443_v46 = vpop.f32.mrb[5].mxu1 }
 0x104   : > { %v412_v47 = vadd.f32 %v603_v16, %v411_v45  ;;  %v444_v48 = vadd.f32 %v603_v16, %v443_v46  ;;  %v661_v49 = vpop.f32.mrb[6].mxu0  ;;  %v669_v50 = vpop.f32.mrb[6].mxu1 }
 0x105   : > { %v464_v51 = vmax.f32 %v420_v43, 0.0  ;;  %v472_v52 = vmax.f32 %v452_v44, 0.0  ;;  %v423_v53 = vadd.f32 %v661_v49, %v603_v16  ;;  %v455_v54 = vadd.f32 %v669_v50, %v603_v16  ;;  %v414_v55 = vpop.f32.mrb[7].mxu0  ;;  %v446_v56 = vpop.f32.mrb[7].mxu1 }
 0x106   : > { %v462_v57 = vmax.f32 %v412_v47, 0.0  ;;  %v470_v58 = vmax.f32 %v444_v48, 0.0  ;;  %v415_v59 = vadd.f32 %v603_v16, %v414_v55  ;;  %v447_v60 = vadd.f32 %v603_v16, %v446_v56 }
 0x107   : > { %480 = vst [vmem:[%s835_s19 + $0x30] sm:$0xff] %v464_v51  ;;  %488 = vst [vmem:[%s835_s19 + $0x70] sm:$0xff] %v472_v52  ;;  %v465_v61 = vmax.f32 %v423_v53, 0.0  ;;  %v473_v62 = vmax.f32 %v455_v54, 0.0 }
 0x108   : > { %478 = vst [vmem:[%s835_s19 + $0x20] sm:$0xff] %v462_v57  ;;  %486 = vst [vmem:[%s835_s19 + $0x60] sm:$0xff] %v470_v58  ;;  %v463_v63 = vmax.f32 %v415_v59, 0.0  ;;  %v471_v0 = vmax.f32 %v447_v60, 0.0 }
 0x109   : > { %481 = vst [vmem:[%s835_s19 + $0x38] sm:$0xff] %v465_v61  ;;  %489 = vst [vmem:[%s835_s19 + $0x78] sm:$0xff] %v473_v62 }
 0x10a   : > { %479 = vst [vmem:[%s835_s19 + $0x28] sm:$0xff] %v463_v63  ;;  %487 = vst [vmem:[%s835_s19 + $0x68] sm:$0xff] %v471_v0 }
 0x10b PF: > { %s13_s14 = sadd.s32 1, %s748_s14   ;;  %s866_s12 = smov %s744_s13 }
 0x10c   : > { %p10_p5 = scmp.ge.s32.totalorder %s13_s14, 6   ;;  %s867_s13 = smov %s869_s15 }
 0x10e   :  { %12 = sbr.rel (!%p10_p5) target bundleno = 2 (0x2), region = 68 }

</bundles_post_ra>
